<compile_context>
chip_gen: v7x
topology: tpu7x:2x2x1
jax: 0.10.0
libtpu: 0.0.40
codegen_flags: <defaults>
</compile_context>

<pallas_src>
import functools
import math

import jax
import jax.numpy as jnp
from jax.experimental import pallas as pl
from jax.experimental.pallas import tpu as pltpu

_LANES = 128
_SUBLANES = 8
_BLOCK_BYTES_TARGET = 4 * 1024 * 1024   # per block buffer (in or out)
_VMEM_LIMIT_BYTES = 32 * 1024 * 1024    # portable: <= v7x scoped, > v5e default


def _drop_path_rows_kernel(bits_ref, x_ref, o_ref, *, inv_keep, thresh):
    """Lane-aligned path. One grid step == one (sample, row-tile).

    bits_ref : SMEM int32[B]       -- scalar-prefetched uniform bits in [0, 2^24)
    x_ref    : VMEM (1, TR, 128)   -- input tile of the current sample
    o_ref    : VMEM (1, TR, 128)   -- output tile
    """
    b = pl.program_id(0)
    # keep iff U >= drop_prob  <=>  bits >= drop_prob * 2^24  (exact int compare)
    keep = bits_ref[b] >= thresh
    scale = jnp.where(keep, jnp.float32(inv_keep), jnp.float32(0.0))
    # Multiply against the f32 scalar, cast the product (matches x.div(keep_prob)
    # numerics more closely for bf16 inputs).  This op is HBM-bound; the extra
    # f32 VALU work is free slack.
    o_ref[...] = (x_ref[...] * scale).astype(o_ref.dtype)


def _drop_path_flat_kernel(x_ref, scale_ref, o_ref):
    """Ragged-N fallback. One grid step == one (B, TN) column tile.

    x_ref     : VMEM (B, TN)
    scale_ref : VMEM (B, 1) f32    -- per-sample scale, broadcast along lanes
    o_ref     : VMEM (B, TN)
    """
    o_ref[...] = (x_ref[...] * scale_ref[...]).astype(o_ref.dtype)


def drop_path_pallas(x, key, drop_prob: float = 0.0, training: bool = False,
                     *, block_bytes: int = _BLOCK_BYTES_TARGET):
    """Pallas implementation of drop_path()."""
    if drop_prob == 0.0 or not training:
        return x

    keep_prob = 1.0 - drop_prob
    inv_keep = 1.0 / keep_prob
    B = x.shape[0]
    N = int(math.prod(x.shape[1:]))
    itemsize = jnp.dtype(x.dtype).itemsize

    # Analogue of torch.rand((B,1,1,1)): one uniform per batch element, carried
    # as 24-bit integer random bits.  keep iff bits >= ceil(drop_prob * 2^24).
    bits = jax.random.randint(key, (B,), 0, 1 << 24, dtype=jnp.int32)
    thresh = int(math.ceil(drop_prob * (1 << 24)))

    if N % _LANES == 0:
        # --- Lane-aligned path (always taken inside AetherNet: N = 128*H*W) ---
        rows = N // _LANES
        xr = x.reshape(B, rows, _LANES)

        # Byte-targeted row tile: ~block_bytes per buffer, multiple of 8 rows.
        tr = max(_SUBLANES,
                 (block_bytes // (_LANES * itemsize)) // _SUBLANES * _SUBLANES)
        if tr >= rows:
            tr = rows                      # whole sample in one block (legal: full dim)
        n_row_tiles = pl.cdiv(rows, tr)    # partial trailing tile is masked by Pallas

        kernel = functools.partial(_drop_path_rows_kernel,
                                   inv_keep=inv_keep, thresh=thresh)
        out = pl.pallas_call(
            kernel,
            out_shape=jax.ShapeDtypeStruct(xr.shape, xr.dtype),
            grid_spec=pltpu.PrefetchScalarGridSpec(
                num_scalar_prefetch=1,
                grid=(B, n_row_tiles),
                in_specs=[
                    pl.BlockSpec((1, tr, _LANES), lambda b, r, bits_ref: (b, r, 0)),
                ],
                out_specs=pl.BlockSpec((1, tr, _LANES), lambda b, r, bits_ref: (b, r, 0)),
            ),
            compiler_params=pltpu.CompilerParams(
                # Both axes parallel: v7x's two TensorCores can split on either
                # (sample or row-tile) axis; v5e/v6e (1 TC) are unaffected.
                dimension_semantics=("parallel", "parallel"),
                vmem_limit_bytes=_VMEM_LIMIT_BYTES,
            ),
        )(bits, xr)
        return out.reshape(x.shape)

    # --- Ragged-N fallback (N % 128 != 0): flat (B, N) slab, no host pad/slice ---
    xf = x.reshape(B, N)
    scale = (bits >= thresh).astype(jnp.float32).reshape(B, 1) * jnp.float32(inv_keep)

    # Account for sublane padding of the B rows (B < 8 pads to 8 in VMEM).
    padded_b = ((B + _SUBLANES - 1) // _SUBLANES) * _SUBLANES
    tn = max(_LANES,
             (block_bytes // (padded_b * itemsize)) // _LANES * _LANES)
    if tn >= N:
        tn = N                             # full extent (legal even if N % 128 != 0)
    n_col_tiles = pl.cdiv(N, tn)           # partial trailing lane tile masked by Pallas

    out = pl.pallas_call(
        _drop_path_flat_kernel,
        out_shape=jax.ShapeDtypeStruct((B, N), x.dtype),
        grid=(n_col_tiles,),
        in_specs=[
            pl.BlockSpec((B, tn), lambda j: (0, j)),
            pl.BlockSpec((B, 1), lambda j: (0, 0)),
        ],
        out_specs=pl.BlockSpec((B, tn), lambda j: (0, j)),
        compiler_params=pltpu.CompilerParams(
            dimension_semantics=("parallel",),
            vmem_limit_bytes=_VMEM_LIMIT_BYTES,
        ),
    )(xf, scale)
    return out.reshape(x.shape)


class DropPath:
    """JAX/Pallas port of the PyTorch DropPath module."""

    def __init__(self, drop_prob=None):
        self.drop_prob = 0.0 if drop_prob is None else float(drop_prob)
        self.training = True

    def __call__(self, x, key):
        return drop_path_pallas(x, key, self.drop_prob, self.training)


if __name__ == "__main__":
    root = jax.random.PRNGKey(0)
    k_x1, k_x2, k_x3, k_x4, k_drop = jax.random.split(root, 5)

    drop_prob = 0.25
    keep_prob = 1.0 - drop_prob
    module = DropPath(drop_prob)

    def reference(x, key):
        bits = jax.random.randint(key, (x.shape[0],), 0, 1 << 24, dtype=jnp.int32)
        thresh = int(math.ceil(drop_prob * (1 << 24)))
        scale = jnp.where(bits >= thresh, jnp.float32(1.0 / keep_prob),
                          jnp.float32(0.0))
        scale = scale.reshape((x.shape[0],) + (1,) * (x.ndim - 1))
        return (x.astype(jnp.float32) * scale).astype(x.dtype)

    # --- Case 1: lane-aligned NCHW input (AetherBlock layout), default tiles ---
    x1 = jax.random.normal(k_x1, (2, 4, 16, 16), dtype=jnp.float32)
    y1 = jax.block_until_ready(module(x1, k_drop))
    assert jnp.allclose(y1, reference(x1, k_drop), atol=1e-6), "mismatch (case 1)"

    # --- Case 2: lane-aligned, small forced tiles -> multi-tile grid with a
    # partial trailing row tile (rows=36, tr=8 -> 5 tiles, last masked) ---
    x2 = jax.random.normal(k_x2, (2, 9, 16, 32), dtype=jnp.float32)
    y2 = jax.block_until_ready(
        drop_path_pallas(x2, k_drop, drop_prob, True, block_bytes=4096))
    assert jnp.allclose(y2, reference(x2, k_drop), atol=1e-6), "mismatch (case 2)"

    # --- Case 3: ragged N (not a multiple of 128) -> flat (B, N) path with a
    # partial trailing lane tile; no host-side pad/slice copies ---
    x3 = jax.random.normal(k_x3, (2, 5, 13, 7), dtype=jnp.float32)
    y3 = jax.block_until_ready(
        drop_path_pallas(x3, k_drop, drop_prob, True, block_bytes=2048))
    assert jnp.allclose(y3, reference(x3, k_drop), atol=1e-6), "mismatch (case 3)"

    # --- Case 4: bf16 input (scale applied in f32, product cast back) ---
    x4 = jax.random.normal(k_x4, (2, 4, 16, 16), dtype=jnp.bfloat16)
    y4 = jax.block_until_ready(module(x4, k_drop))
    assert jnp.allclose(y4.astype(jnp.float32),
                        reference(x4, k_drop).astype(jnp.float32),
                        atol=1e-2), "mismatch (case 4)"

    # --- Eval path (or drop_prob == 0): identity, no kernel launch ---
    module.training = False
    y_eval = jax.block_until_ready(module(x1, k_drop))
    assert jnp.array_equal(y_eval, x1)

    print("KERNEL_OK")
</pallas_src>

<mosaic_0001>
module attributes {stable_mosaic.version = 11 : i64} {
  func.func @_drop_path_rows_kernel(%arg0: i32, %arg1: i32, %arg2: memref<2xi32, #tpu.memory_space<smem>>, %arg3: memref<1x8x128xf32, #tpu.memory_space<vmem>>, %arg4: memref<1x8x128xf32, #tpu.memory_space<vmem>>) attributes {dimension_semantics = [#tpu.dimension_semantics<parallel>, #tpu.dimension_semantics<parallel>], iteration_bounds = array<i64: 2, 1>, scalar_prefetch = 1 : i64, scratch_operands = 0 : i64, tpu.core_type = #tpu.core_type<tc>, window_params = [{transform_indices = @transform_0, window_bounds = array<i64: 1, 8, 128>}, {transform_indices = @transform_1, window_bounds = array<i64: 1, 8, 128>}]} {
    %0 = arith.index_cast %arg0 : i32 to index
    %1 = memref.load %arg2[%0] : memref<2xi32, #tpu.memory_space<smem>>
    %c4194304_i32 = arith.constant 4194304 : i32
    %2 = arith.cmpi sge, %1, %c4194304_i32 : i32
    %cst = arith.constant 1.33333337 : f32
    %cst_0 = arith.constant 0.000000e+00 : f32
    %3 = arith.select %2, %cst, %cst_0 : f32
    %c0 = arith.constant 0 : index
    %c0_1 = arith.constant 0 : index
    %c0_2 = arith.constant 0 : index
    %4 = vector.load %arg3[%c0, %c0_1, %c0_2] : memref<1x8x128xf32, #tpu.memory_space<vmem>>, vector<1x8x128xf32>
    %5 = vector.broadcast %3 : f32 to vector<1x8x128xf32>
    %6 = arith.mulf %4, %5 : vector<1x8x128xf32>
    %c0_3 = arith.constant 0 : index
    %c0_4 = arith.constant 0 : index
    %c0_5 = arith.constant 0 : index
    %7 = vector.load %arg4[%c0_3, %c0_4, %c0_5] : memref<1x8x128xf32, #tpu.memory_space<vmem>>, vector<1x8x128xf32>
    tpu.vector_store %arg4[%c0_3, %c0_4, %c0_5], %6 {strides = array<i32>} : memref<1x8x128xf32, #tpu.memory_space<vmem>>, vector<1x8x128xf32>,
    return
  }
  func.func @transform_0(%arg0: i32, %arg1: i32, %arg2: memref<2xi32, #tpu.memory_space<smem>>) -> (i32, i32, i32) {
    %c0_i32 = arith.constant 0 : i32
    %c0_i32_0 = arith.constant 0 : i32
    return %arg0, %arg1, %c0_i32 : i32, i32, i32
  }
  func.func @transform_1(%arg0: i32, %arg1: i32, %arg2: memref<2xi32, #tpu.memory_space<smem>>) -> (i32, i32, i32) {
    %c0_i32 = arith.constant 0 : i32
    %c0_i32_0 = arith.constant 0 : i32
    return %arg0, %arg1, %c0_i32 : i32, i32, i32
  }
}

</mosaic_0001>

<bundles_post_ra>
// kernel: tpu_custom_call.1
= control target key start
LH: loop header
LB: loop body
LE: loop exit
PB: predicated region body
PF: predicated region fallthrough
CT: control target
= control target key end

     0   :  { %s661_s0 = inlined_call_operand.hbm [shape: s32[2], index: 0, kind: input, shape index: {}]   ;;  %s662_s1 = inlined_call_operand.hbm [shape: f32[2,8,128], index: 1, kind: input, shape index: {}]   ;;  %s663_s2 = inlined_call_operand.hbm [shape: f32[2,8,128], index: 2, kind: output, shape index: {}]  }
   0x1   :  { %s332_s11 = scalar_lea.hbm %s661_s0, 16 }
   0x2   :  { %p333_p0 = scmp.ne.s32.totalorder %s661_s0, %s332_s11  ;;  %p336_p1 = scmp.lt.u32.totalorder %s332_s11, %s661_s0 }
   0x4   :  { %p338_p2 = pnand %p336_p1, %p333_p0 }
   0x6   :  { %341 = shalt.err (!%p338_p2)  }
   0x7   :  { %s458_s16 = smov [#allocation3]  }
   0x8   :  { %8 = dma.hbm_to_smem %s661_s0, 16, %s458_s16, [#allocation2] }
   0x9   :  { %424 = dma.done.wait [#allocation2], 16 }
   0xa   :  { %425 = vsyncadd [#allocation2], 4294967280 }
   0xb   :  { %10 = sfence }
   0xc   :  { %11 = vsyncpa [#allocation5], 0 }
   0xd   :  { %13 = vsyncpa [#allocation5 + $0x1], 0 }
   0xe   :  { %14 = vsyncpa [#allocation6], 0 }
   0xf   :  { %16 = vsyncpa [#allocation6 + $0x1], 0  ;;  %s488_s19 = smov 0   ;;  %s490_s20 = smov 0  }
  0x10   :  { %s492_s21 = smov 0   ;;  %s494_s22 = smov 0  }
  0x11   :  { %s496_s23 = smov 0   ;;  %s498_s24 = smov 0  }
  0x12 LB: > { %s256_s0 = sadd.s32 4294967295, %s456_s24   ;;  %s257_s25 = sadd.s32 4294967294, %s456_s24   ;;  %s456_s24 = sphi %s498_s24, %s22_s24   ;;  %s452_s23 = sphi %s496_s23, %s679_s23   ;;  %s448_s22 = sphi %s494_s22, %s678_s22   ;;  %s444_s21 = sphi %s492_s21, %s677_s21   ;;  %s440_s20 = sphi %s490_s20, %s676_s20   ;;  %s436_s19 = sphi %s488_s19, %s675_s19  }
  0x13   : > { %s34_s26 = sadd.s32 1, %s452_s23  ;;  %s43_s27 = sadd.s32 1, %s444_s21 }
  0x14   : > { %p36_p3 = scmp.ge.s32.totalorder %s34_s26, 2  ;;  %p50_p4 = scmp.ne.s32.totalorder %s444_s21, %s440_s20 }
  0x15   : > { %p51_p5 = scmp.eq.s32.totalorder %s456_s24, 0  ;;  %p56_p6 = scmp.ne.s32.totalorder %s440_s20, %s436_s19 }
  0x16   : > { %s681_s26 = smov (%p36_p3, %s34_s26), 0  ;;  %p57_p8 = scmp.eq.s32.totalorder %s256_s0, 0 }
  0x17   : > { %p529_p7 = por %p51_p5, %p50_p4  ;;  %s38_s29 = ssub.s32 %s452_s23, %s681_s26 }
  0x18   : > { %p82_p9 = scmp.eq.s32.totalorder %s256_s0, 1  ;;  %p41_p10 = scmp.eq.s32.totalorder %s38_s29, 0 }
  0x19   : > { %p535_p11 = por %p57_p8, %p56_p6  ;;  %p88_p13 = scmp.eq.s32.totalorder %s257_s25, 1 }
  0x1a   : > { %p539_p12 = por %p82_p9, %p50_p4  ;;  %p281_p2 = scmp.lt.s32.totalorder %s456_s24, 2 }
  0x1b   : > { %s544_s4 = scalar_select %p41_p10, %s444_s21, %s43_s27  }
  0x1c   : > { %s667_s3 = scalar_select %p539_p12, 1, 0 }
  0x1d   : > { %p546_p0 = por %p88_p13, %p56_p6  ;;  %s108_s6 = sand.u32 1, %s444_s21  }
  0x1e   : > { %s260_s7 = sshll.u32 %s108_s6, 3  ;;  %s261_s8 = sshll.u32 %s452_s23, 7 }
  0x1f   : > { %s668_s5 = scalar_select %p546_p0, 1, 0 }
  0x20   : > { %s557_s11 = scalar_lea.hbm %s662_s1, %s261_s8  ;;  %s112_s12 = scalar_lea.vmem [#allocation4], %s260_s7 }
  0x21   : > { %s120_s13 = sshll.u32 %s112_s12, 4  ;;  %p563_p3 = pnand %p281_p2, %p529_p7  ;;  %s559_s13 = int_to_ptr.vmem [resolvable:$true] %s120_s13 }
  0x22   : > { %s109_s15 = scalar_lea.sflag [#allocation5], %s108_s6  ;;  %s342_s16 = scalar_lea.hbm %s557_s11, 128 }
  0x23   : > { %p343_p6 = scmp.ne.s32.totalorder %s557_s11, %s342_s16  ;;  %p344_p8 = pneg %p563_p3 }
  0x24   : > { %s347_s0 = scalar_lea.hbm %s662_s1, 256  ;;  %p348_p7 = scmp.lt.u32.totalorder %s557_s11, %s662_s1 }
  0x25   : > { %p345_p9 = pnand %p344_p8, %p343_p6  ;;  %p349_p13 = scmp.lt.u32.totalorder %s347_s0, %s342_s16 }
  0x26   : > { %p351_p1 = scmp.lt.u32.totalorder %s342_s16, %s557_s11 }
  0x27   : > { %p346_p10 = pneg %p345_p9  ;;  %p350_p2 = por %p349_p13, %p348_p7 }
  0x29   : > { %p352_p4 = por %p351_p1, %p350_p2 }
  0x2b   : > { %p353_p5 = pnand %p352_p4, %p346_p10 }
  0x2d   : > { %356 = shalt.err (!%p353_p5)
}
  0x2e   : > { %s357_s28 = scalar_lea.vmem %s559_s13, 128  ;;  %s459_s29 = smov [#allocation4]  }
  0x2f   : > { %p358_p6 = scmp.ne.s32.totalorder %s559_s13, %s357_s28  ;;  %s362_s6 = sshll.u32 %s459_s29, 4  ;;  %s363_s6 = int_to_ptr.vmem [resolvable:$false] %s362_s6 }
  0x30   : > { %s364_s7 = scalar_lea.vmem %s363_s6, 256  ;;  %p365_p12 = scmp.lt.s32.totalorder %s559_s13, %s363_s6 }
  0x31   : > { %p360_p9 = pnand %p358_p6, %p344_p8  ;;  %p366_p7 = scmp.lt.s32.totalorder %s364_s7, %s357_s28 }
  0x33   : > { %p361_p0 = pneg %p360_p9  ;;  %p367_p13 = por %p366_p7, %p365_p12 }
  0x35   : > { %p368_p1 = pnand %p367_p13, %p361_p0 }
  0x37   : > { %371 = shalt.err (!%p368_p1)
}
  0x38   : > { %276 = dma.hbm_to_vmem [thread:$0]  (!%p563_p3), %s557_s11, 128, %s559_s13, %s109_s15  }
  0x39   : > { %p670_p4 = scmp.lt.s32.totalorder %s456_s24, 3  ;;  %p671_p5 = scmp.ge.s32.totalorder %s456_s24, 1 }
  0x3b   : > { %p126_p8 = pnand %p671_p5, %p670_p4 }
  0x3c   : > { %s599_s8 = sand.u32 (!%p126_p8), 1, %s440_s20  }
  0x3d   : > { %129 = sbr.rel (%p126_p8) target bundleno = 97 (0x61), region = 24  ;;  %s263_s9 = sshll.u32 (!%p126_p8), %s599_s8, 3 }
  0x3e   : > { %s132_s10 = scalar_lea.sflag (!%p126_p8), [#allocation5], %s599_s8  ;;  %s135_s12 = scalar_lea.vmem (!%p126_p8), [#allocation4], %s263_s9 }
  0x44   : > { %427 = dma.done.wait (%p535_p11), %s132_s10, 128  }
  0x45   : > { %429 = vsyncadd (%p535_p11), %s132_s10, 4294967168  ;;  %s154_s11 = sld [smem:[#allocation3 + %s448_s22]]  ;;  %s153_s13 = scalar_lea.vmem [#allocation7], %s263_s9  ;;  %v157_v0 = vld [vmem:[%s135_s12] sm:$0xff] }
  0x46   : > { %s176_s14 = sshll.u32 %s153_s13, 4  ;;  %s266_s15 = sshll.u32 %s448_s22, 7  ;;  %s609_s14 = int_to_ptr.vmem [resolvable:$true] %s176_s14 }
  0x47   : > { %s614_s30 = scalar_lea.hbm %s663_s2, %s266_s15  ;;  %s162_s0 = scalar_lea.sflag [#allocation6], %s599_s8 }
  0x48   : > { %s372_s25 = scalar_lea.vmem %s609_s14, 128  ;;  %p672_p0 = scmp.ne.s32.totalorder %s667_s3, 0 }
  0x49   : > { %p373_p11 = scmp.ne.s32.totalorder %s609_s14, %s372_s25  ;;  %s460_s22 = smov [#allocation7]  }
  0x4a   : > { %s376_s27 = sshll.u32 %s460_s22, 4  ;;  %s377_s27 = int_to_ptr.vmem [resolvable:$false] %s376_s27 }
  0x4b   : > { %p155_p12 = scmp.ge.s32.totalorder %s154_s11, 4194304  ;;  %p374_p3 = pnand %p373_p11, %p672_p0 }
  0x4c   : > { %s378_s28 = scalar_lea.vmem %s377_s27, 256  ;;  %p379_p2 = scmp.lt.s32.totalorder %s609_s14, %s377_s27 }
  0x4d   : > { %s156_s16 = scalar_select %p155_p12, 1.3333334, 0.0 }
  0x4e   : > { %p375_p10 = pneg %p374_p3  ;;  %p380_p6 = scmp.lt.s32.totalorder %s378_s28, %s372_s25 }
  0x4f   : > { %v158_v1 = vstv %s156_s16 }
  0x50   : > { %v159_v2 = vmul.f32 %v158_v1, %v157_v0  ;;  %p381_p9 = por %p380_p6, %p379_p2 }
  0x52   : > { %160 = vst [vmem:[%s153_s13] sm:$0xff] %v159_v2  ;;  %p382_p7 = pnand %p381_p9, %p375_p10 }
  0x54   : > { %385 = shalt.err (!%p382_p7)
}
  0x55   : > { %s386_s29 = scalar_lea.hbm %s614_s30, 128  ;;  %s390_s8 = scalar_lea.hbm %s663_s2, 256 }
  0x56   : > { %p387_p13 = scmp.ne.s32.totalorder %s614_s30, %s386_s29  ;;  %p391_p5 = scmp.lt.u32.totalorder %s614_s30, %s663_s2 }
  0x57   : > { %p392_p8 = scmp.lt.u32.totalorder %s390_s8, %s386_s29  ;;  %p394_p11 = scmp.lt.u32.totalorder %s386_s29, %s614_s30 }
  0x58   : > { %p388_p1 = pnand %p387_p13, %p672_p0 }
  0x59   : > { %p393_p12 = por %p392_p8, %p391_p5 }
  0x5a   : > { %p389_p4 = pneg %p388_p1 }
  0x5b   : > { %p395_p3 = por %p394_p11, %p393_p12 }
  0x5d   : > { %p396_p10 = pnand %p395_p3, %p389_p4 }
  0x5f   : > { %399 = shalt.err (!%p396_p10)
}
  0x60   : > { %271 = dma.vmem_to_hbm [thread:$0]  (%p672_p0), %s609_s14, 128, %s614_s30, %s162_s0  }
  0x61 PF: > { %s188_s12 = sand.u32 1, %s436_s19   ;;  %p673_p2 = scmp.ne.s32.totalorder %s668_s5, 0 }
  0x62   : > { %p674_p6 = scmp.ge.s32.totalorder %s456_s24, 2  ;;  %s189_s11 = scalar_lea.sflag [#allocation6], %s188_s12 }
  0x64   : > { %p278_p9 = pnand %p674_p6, %p673_p2 }
  0x66   : > { %431 = dma.done.wait (!%p278_p9), %s189_s11, 128  }
  0x67   : > { %433 = vsyncadd (!%p278_p9), %s189_s11, 4294967168  ;;  %s22_s24 = sadd.s32 1, %s456_s24   ;;  %s675_s19 = smov %s440_s20 }
  0x68   : > { %p19_p7 = scmp.ge.s32.totalorder %s22_s24, 4   ;;  %s676_s20 = smov %s444_s21 }
  0x69   : > { %s677_s21 = smov %s544_s4  ;;  %s678_s22 = smov %s452_s23 }
  0x6a   : > { %s679_s23 = smov %s681_s26  ;;  %21 = sbr.rel (!%p19_p7) target bundleno = 18 (0x12), region = 69 }
  0x71   :  { %194 = vsyncpa [#allocation5], 1 }
  0x72   :  { %196 = vsyncpa [#allocation5 + $0x1], 1 }
  0x73   :  { %197 = vsyncpa [#allocation6], 1 }
  0x74   :  { %199 = vsyncpa [#allocation6 + $0x1], 1 }

</bundles_post_ra>
